<compile_context>
chip_gen: v6e
topology: v6e:2x2x1
jax: 0.10.0
libtpu: 0.0.40
codegen_flags: <defaults>
</compile_context>

<pallas_src>
import jax
import jax.numpy as jnp
from jax.experimental import pallas as pl
from jax.experimental.pallas import tpu as pltpu


# ---------------------------------------------------------------------------
# Shared in-kernel MLP math:
#   logits = sigmoid(sigmoid(x @ W1 + b1) @ W2 + b2) @ W3 + b3
# Weight refs are packed (fan_in + 1, fan_out); the bias is the last row.
# ---------------------------------------------------------------------------
def _mlp_logits(x, w1b_ref, w2b_ref, w3b_ref):
    def layer(h, wb_ref):
        k = wb_ref.shape[0] - 1                   # static fan_in
        w = wb_ref[0:k, :]                        # (fan_in, fan_out)
        b = wb_ref[k:k + 1, :]                    # (1, fan_out)
        return jnp.dot(h, w, preferred_element_type=jnp.float32) + b

    h = jax.nn.sigmoid(layer(x, w1b_ref))
    h = jax.nn.sigmoid(layer(h, w2b_ref))
    return layer(h, w3b_ref)                      # (tile_b, class_num) f32


# ---------------------------------------------------------------------------
# Kernel 1 (y is None): logits only.  Tiled over the batch so realistic batch
# sizes get double-buffered row tiles while the tiny packed weights stay
# VMEM-resident across grid steps (index_map always returns (0, 0)).
# ---------------------------------------------------------------------------
def mlp_kernel(x_ref, w1b_ref, w2b_ref, w3b_ref, out_ref):
    out_ref[...] = _mlp_logits(
        x_ref[...], w1b_ref, w2b_ref, w3b_ref).astype(out_ref.dtype)


def mlp_forward(x, packed):
    w1b, w2b, w3b = packed
    B, D = x.shape
    C = w3b.shape[1]

    # Full-array batch block for small B; 512-row tiles (multiple of 8, and a
    # few MiB at most so it also fits v7x's 64 MiB VMEM) otherwise.
    tile_b = B if B <= 512 else 512
    Bp = pl.cdiv(B, tile_b) * tile_b
    if Bp != B:
        x = jnp.pad(x, ((0, Bp - B), (0, 0)))

    out = pl.pallas_call(
        mlp_kernel,
        out_shape=jax.ShapeDtypeStruct((Bp, C), jnp.float32),
        grid_spec=pltpu.PrefetchScalarGridSpec(
            num_scalar_prefetch=0,
            grid=(Bp // tile_b,),
            in_specs=[
                pl.BlockSpec((tile_b, D), lambda i: (i, 0)),
                pl.BlockSpec(w1b.shape, lambda i: (0, 0)),
                pl.BlockSpec(w2b.shape, lambda i: (0, 0)),
                pl.BlockSpec(w3b.shape, lambda i: (0, 0)),
            ],
            out_specs=pl.BlockSpec((tile_b, C), lambda i: (i, 0)),
        ),
        # batch axis is independent -> v7x's two TensorCores split it; no-op on v5e/v6e
        compiler_params=pltpu.CompilerParams(
            dimension_semantics=("parallel",)),
    )(x, w1b, w2b, w3b)
    return out[:B]


# ---------------------------------------------------------------------------
# Kernel 2 (y given): FUSED MLP + CrossEntropyLoss (mean reduction).
# Logits stay in vregs (never written back to HBM); labels arrive via scalar
# prefetch (SMEM, no VMEM tile / extra vector DMA); the scalar loss is written
# straight to an SMEM output instead of a lane-sparse (1,1) VMEM tile.
# ---------------------------------------------------------------------------
def mlp_ce_kernel(y_ref, x_ref, w1b_ref, w2b_ref, w3b_ref, loss_ref):
    logits = _mlp_logits(x_ref[...], w1b_ref, w2b_ref, w3b_ref)   # (B, C) f32
    B, C = logits.shape

    # Numerically stable log-softmax.
    m = jnp.max(logits, axis=-1, keepdims=True)
    z = logits - m
    lse = jnp.log(jnp.sum(jnp.exp(z), axis=-1, keepdims=True))
    logp = z - lse                                                # (B, C)

    # Build the (B, C) label matrix from scalar SMEM reads (B is small/static),
    # then select the target log-prob per row with a one-hot mask.
    row_ids = jax.lax.broadcasted_iota(jnp.int32, (B, C), 0)
    col_ids = jax.lax.broadcasted_iota(jnp.int32, (B, C), 1)
    labels = jnp.zeros((B, C), jnp.int32)
    for b in range(B):                       # static unrolled; B == batch here
        labels = jnp.where(row_ids == b, y_ref[b], labels)
    nll_sum = -jnp.sum(jnp.where(col_ids == labels, logp, 0.0))
    loss_ref[0, 0] = nll_sum * (1.0 / B)     # mean reduction, scalar -> SMEM


def mlp_ce_loss(x, packed, y):
    w1b, w2b, w3b = packed
    B, D = x.shape
    loss = pl.pallas_call(
        mlp_ce_kernel,
        out_shape=jax.ShapeDtypeStruct((1, 1), jnp.float32),
        grid_spec=pltpu.PrefetchScalarGridSpec(
            num_scalar_prefetch=1,                       # y -> SMEM
            grid=(1,),
            in_specs=[
                pl.BlockSpec((B, D), lambda i, y_p: (0, 0)),
                pl.BlockSpec(w1b.shape, lambda i, y_p: (0, 0)),
                pl.BlockSpec(w2b.shape, lambda i, y_p: (0, 0)),
                pl.BlockSpec(w3b.shape, lambda i, y_p: (0, 0)),
            ],
            out_specs=pl.BlockSpec(memory_space=pltpu.MemorySpace.SMEM),
        ),
        compiler_params=pltpu.CompilerParams(
            dimension_semantics=("arbitrary",)),
    )(y.astype(jnp.int32), x, w1b, w2b, w3b)
    return loss[0, 0]


# ---------------------------------------------------------------------------
# TorchDemo equivalent: forward(x) -> logits ; forward(x, y) -> scalar CE loss.
# ---------------------------------------------------------------------------
def torch_demo_forward(x, packed, y=None):
    if y is not None:
        return mlp_ce_loss(x, packed, y)
    return mlp_forward(x, packed)


def init_params(key, input_size, hidden_size, class_num):
    # Deterministic init mimicking nn.Linear's uniform(-1/sqrt(fan_in), 1/sqrt(fan_in)),
    # packed per layer as (fan_in + 1, fan_out) = [W^T ; b].
    ks = jax.random.split(key, 6)

    def lin(kw, kb, fan_in, fan_out):
        bound = 1.0 / jnp.sqrt(fan_in)
        w = jax.random.uniform(kw, (fan_in, fan_out), jnp.float32, -bound, bound)
        b = jax.random.uniform(kb, (1, fan_out), jnp.float32, -bound, bound)
        return jnp.concatenate([w, b], axis=0)

    w1b = lin(ks[0], ks[1], input_size, hidden_size)
    w2b = lin(ks[2], ks[3], hidden_size, hidden_size)
    w3b = lin(ks[4], ks[5], hidden_size, class_num)
    return (w1b, w2b, w3b)


if __name__ == "__main__":
    key = jax.random.PRNGKey(0)
    k_x, k_p, k_y = jax.random.split(key, 3)

    batch, input_size, hidden_size, class_num = 8, 32, 64, 8
    x = jax.random.normal(k_x, (batch, input_size), jnp.float32)
    y = jax.random.randint(k_y, (batch,), 0, class_num, jnp.int32)
    packed = init_params(k_p, input_size, hidden_size, class_num)

    # y=None path: logits
    logits = torch_demo_forward(x, packed)
    jax.block_until_ready(logits)

    # y given path: scalar cross-entropy loss (single fused kernel)
    loss = torch_demo_forward(x, packed, y)
    jax.block_until_ready(loss)

    # Reference check against plain JAX
    def ref_forward(x, packed, y=None):
        w1b, w2b, w3b = packed

        def layer(h, wb):
            return h @ wb[:-1] + wb[-1:]

        h = jax.nn.sigmoid(layer(x, w1b))
        h = jax.nn.sigmoid(layer(h, w2b))
        logits = layer(h, w3b)
        if y is None:
            return logits
        logp = jax.nn.log_softmax(logits, axis=-1)
        return -jnp.mean(jnp.take_along_axis(logp, y[:, None], axis=-1))

    assert jnp.allclose(logits, ref_forward(x, packed), atol=1e-5)
    assert jnp.allclose(loss, ref_forward(x, packed, y), atol=1e-5)

    print("KERNEL_OK")
</pallas_src>

<mosaic_0001>
module attributes {stable_mosaic.version = 11 : i64} {
  func.func @mlp_kernel(%arg0: i32, %arg1: memref<8x32xf32, #tpu.memory_space<vmem>>, %arg2: memref<33x64xf32, #tpu.memory_space<vmem>>, %arg3: memref<65x64xf32, #tpu.memory_space<vmem>>, %arg4: memref<65x8xf32, #tpu.memory_space<vmem>>, %arg5: memref<8x8xf32, #tpu.memory_space<vmem>>) attributes {dimension_semantics = [#tpu.dimension_semantics<parallel>], iteration_bounds = array<i64: 1>, scalar_prefetch = 0 : i64, scratch_operands = 0 : i64, tpu.core_type = #tpu.core_type<tc>, window_params = [{transform_indices = @transform_0, window_bounds = array<i64: 8, 32>}, {pipeline_mode = #tpu.pipeline_mode<synchronous>, transform_indices = @transform_1, window_bounds = array<i64: 33, 64>}, {pipeline_mode = #tpu.pipeline_mode<synchronous>, transform_indices = @transform_2, window_bounds = array<i64: 65, 64>}, {pipeline_mode = #tpu.pipeline_mode<synchronous>, transform_indices = @transform_3, window_bounds = array<i64: 65, 8>}, {transform_indices = @transform_4, window_bounds = array<i64: 8, 8>}]} {
    %c0 = arith.constant 0 : index
    %c0_0 = arith.constant 0 : index
    %0 = vector.load %arg1[%c0, %c0_0] : memref<8x32xf32, #tpu.memory_space<vmem>>, vector<8x32xf32>
    %c0_1 = arith.constant 0 : index
    %c0_2 = arith.constant 0 : index
    %1 = vector.load %arg2[%c0_1, %c0_2] : memref<33x64xf32, #tpu.memory_space<vmem>>, vector<32x64xf32>
    %c32 = arith.constant 32 : index
    %c0_3 = arith.constant 0 : index
    %2 = vector.load %arg2[%c32, %c0_3] : memref<33x64xf32, #tpu.memory_space<vmem>>, vector<1x64xf32>
    %cst = arith.constant dense<0.000000e+00> : vector<8x64xf32>
    %3 = tpu.matmul %0, %1, %cst {dimension_numbers = #tpu.dot_dimension_numbers<[1], [0], [0], [1], [0, 0, 1, 1], [], []>} : vector<8x32xf32>, vector<32x64xf32>, vector<8x64xf32> -> vector<8x64xf32>
    %4 = vector.broadcast %2 : vector<1x64xf32> to vector<8x64xf32>
    %5 = arith.addf %3, %4 : vector<8x64xf32>
    %6 = arith.negf %5 : vector<8x64xf32>
    %7 = math.exp %6 : vector<8x64xf32>
    %cst_4 = arith.constant 1.000000e+00 : f32
    %8 = vector.broadcast %cst_4 : f32 to vector<8x64xf32>
    %9 = arith.addf %8, %7 : vector<8x64xf32>
    %10 = arith.divf %8, %9 : vector<8x64xf32>
    %c0_5 = arith.constant 0 : index
    %c0_6 = arith.constant 0 : index
    %11 = vector.load %arg3[%c0_5, %c0_6] : memref<65x64xf32, #tpu.memory_space<vmem>>, vector<64x64xf32>
    %c64 = arith.constant 64 : index
    %c0_7 = arith.constant 0 : index
    %12 = vector.load %arg3[%c64, %c0_7] : memref<65x64xf32, #tpu.memory_space<vmem>>, vector<1x64xf32>
    %cst_8 = arith.constant dense<0.000000e+00> : vector<8x64xf32>
    %13 = tpu.matmul %10, %11, %cst_8 {dimension_numbers = #tpu.dot_dimension_numbers<[1], [0], [0], [1], [0, 0, 1, 1], [], []>} : vector<8x64xf32>, vector<64x64xf32>, vector<8x64xf32> -> vector<8x64xf32>
    %14 = vector.broadcast %12 : vector<1x64xf32> to vector<8x64xf32>
    %15 = arith.addf %13, %14 : vector<8x64xf32>
    %16 = arith.negf %15 : vector<8x64xf32>
    %17 = math.exp %16 : vector<8x64xf32>
    %cst_9 = arith.constant 1.000000e+00 : f32
    %18 = vector.broadcast %cst_9 : f32 to vector<8x64xf32>
    %19 = arith.addf %18, %17 : vector<8x64xf32>
    %20 = arith.divf %18, %19 : vector<8x64xf32>
    %c0_10 = arith.constant 0 : index
    %c0_11 = arith.constant 0 : index
    %21 = vector.load %arg4[%c0_10, %c0_11] : memref<65x8xf32, #tpu.memory_space<vmem>>, vector<64x8xf32>
    %c64_12 = arith.constant 64 : index
    %c0_13 = arith.constant 0 : index
    %22 = vector.load %arg4[%c64_12, %c0_13] : memref<65x8xf32, #tpu.memory_space<vmem>>, vector<1x8xf32>
    %cst_14 = arith.constant dense<0.000000e+00> : vector<8x8xf32>
    %23 = tpu.matmul %20, %21, %cst_14 {dimension_numbers = #tpu.dot_dimension_numbers<[1], [0], [0], [1], [0, 0, 1, 1], [], []>} : vector<8x64xf32>, vector<64x8xf32>, vector<8x8xf32> -> vector<8x8xf32>
    %24 = vector.broadcast %22 : vector<1x8xf32> to vector<8x8xf32>
    %25 = arith.addf %23, %24 : vector<8x8xf32>
    %c0_15 = arith.constant 0 : index
    %c0_16 = arith.constant 0 : index
    %26 = vector.load %arg5[%c0_15, %c0_16] : memref<8x8xf32, #tpu.memory_space<vmem>>, vector<8x8xf32>
    tpu.vector_store %arg5[%c0_15, %c0_16], %25 {strides = array<i32>} : memref<8x8xf32, #tpu.memory_space<vmem>>, vector<8x8xf32>,
    return
  }
  func.func @transform_0(%arg0: i32) -> (i32, i32) {
    %c0_i32 = arith.constant 0 : i32
    %c0_i32_0 = arith.constant 0 : i32
    return %arg0, %c0_i32 : i32, i32
  }
  func.func @transform_1(%arg0: i32) -> (i32, i32) {
    %c0_i32 = arith.constant 0 : i32
    %c0_i32_0 = arith.constant 0 : i32
    %c0_i32_1 = arith.constant 0 : i32
    return %c0_i32, %c0_i32_0 : i32, i32
  }
  func.func @transform_2(%arg0: i32) -> (i32, i32) {
    %c0_i32 = arith.constant 0 : i32
    %c0_i32_0 = arith.constant 0 : i32
    %c0_i32_1 = arith.constant 0 : i32
    return %c0_i32, %c0_i32_0 : i32, i32
  }
  func.func @transform_3(%arg0: i32) -> (i32, i32) {
    %c0_i32 = arith.constant 0 : i32
    %c0_i32_0 = arith.constant 0 : i32
    %c0_i32_1 = arith.constant 0 : i32
    return %c0_i32, %c0_i32_0 : i32, i32
  }
  func.func @transform_4(%arg0: i32) -> (i32, i32) {
    %c0_i32 = arith.constant 0 : i32
    %c0_i32_0 = arith.constant 0 : i32
    return %arg0, %c0_i32 : i32, i32
  }
}

</mosaic_0001>

<bundles_post_ra>
// kernel: tpu_custom_call.1
= control target key start
LH: loop header
LB: loop body
LE: loop exit
PB: predicated region body
PF: predicated region fallthrough
CT: control target
= control target key end

     0   :  { %v416_v1 = vmov 0.0   ;;  %vm417_vm0 = vmmov 0   ;;  %s547_s0 = inlined_call_operand.vmem [shape: f32[8,32], index: 0, kind: input, shape index: {}]   ;;  %s548_s1 = inlined_call_operand.vmem [shape: f32[33,64], index: 1, kind: input, shape index: {}]   ;;  %s549_s2 = inlined_call_operand.vmem [shape: f32[65,64], index: 2, kind: input, shape index: {}]   ;;  %s550_s3 = inlined_call_operand.vmem [shape: f32[65,8], index: 3, kind: input, shape index: {}]   ;;  %s551_s4 = inlined_call_operand.hbm [shape: f32[8,8], index: 4, kind: output, shape index: {}]  }
   0x1   :  { %v22_v0 = vld [vmem:[%s548_s1 + $0x18] sm:$0xff]  ;;  %334 = vmatprep.subr.mxu0 %v416_v1  ;;  %v21_v2 = vld [vmem:[%s548_s1 + $0x10] sm:$0xff]  ;;  %342 = vmatprep.mubr.msk.f32.mxu0 %vm417_vm0, %v416_v1 }
   0x2   :  { %335 = vmatpush3.msra.mxu0 %v22_v0  ;;  %345 = vmatprep.subr.mxu1 %v416_v1 }
   0x3   :  { %9 = vsyncpa [#allocation3], 0  ;;  %336 = vmatprep.subr.mxu0 %v416_v1  ;;  %v20_v3 = vld [vmem:[%s548_s1 + $0x8] sm:$0xff]  ;;  %361 = vmatprep.mubr.msk.f32.mxu1 %vm417_vm0, %v416_v1  ;;  %v19_v4 = vld [vmem:[%s548_s1] sm:$0xff]  ;;  %vm28_vm1 = vcmask 261120   ;;  %vm121_vm2 = vcmask 523264  }
   0x4   :  { %337 = vmatpush3.msra.mxu0 %v21_v2  ;;  %v18_v5 = vld [vmem:[%s547_s0] sm:$0xff]  ;;  %v115_v6 = vld [vmem:[%s549_s2 + $0x38] sm:$0xff]  ;;  %v114_v7 = vld [vmem:[%s549_s2 + $0x30] sm:$0xff]  ;;  %s418_s8 = smov [#allocation2]   ;;  %vm287_vm3 = vcmask 64512  }
   0x5   :  { %338 = vmatprep.subr.mxu0 %v416_v1  ;;  %346 = vmatpush3.msra.mxu1 %v115_v6  ;;  %v113_v8 = vld [vmem:[%s549_s2 + $0x28] sm:$0xff]  ;;  %v112_v9 = vld [vmem:[%s549_s2 + $0x20] sm:$0xff]  ;;  %v111_v10 = vld [vmem:[%s549_s2 + $0x18] sm:$0xff]  ;;  %s295_s9 = sshll.u32 %s418_s8, 4  ;;  %s296_s9 = int_to_ptr.vmem [resolvable:$true] %s295_s9 }
   0x6   :  { %339 = vmatpush3.msra.mxu0 %v20_v3  ;;  %347 = vmatprep.subr.mxu1 %v416_v1  ;;  %v110_v11 = vld [vmem:[%s549_s2 + $0x10] sm:$0xff]  ;;  %v109_v12 = vld [vmem:[%s549_s2 + $0x8] sm:$0xff]  ;;  %v108_v13 = vld [vmem:[%s549_s2] sm:$0xff]  ;;  %p399_p1 = scmp.lt.s32.totalorder %s296_s9, %s296_s9 }
   0x7   :  { %340 = vmatprep.subr.mxu0 %v416_v1  ;;  %348 = vmatpush3.msra.mxu1 %v114_v7  ;;  %v303_v14 = vld [vmem:[%s548_s1 + $0x20] ss:$0 sm:$0xff]  ;;  %v208_v22 = vld [vmem:[%s550_s3 + $0x38] sm:$0xff]  ;;  %v207_v23 = vld [vmem:[%s550_s3 + $0x30] sm:$0xff] }
   0x8   :  { %341 = vmatpush3.msra.mxu0 %v19_v4  ;;  %349 = vmatprep.subr.mxu1 %v416_v1  ;;  %v206_v24 = vld [vmem:[%s550_s3 + $0x28] sm:$0xff]  ;;  %v205_v25 = vld [vmem:[%s550_s3 + $0x20] sm:$0xff]  ;;  %v204_v26 = vld [vmem:[%s550_s3 + $0x18] sm:$0xff] }
   0x9   :  { %343 = vmatmul.mubr.msk.f32.vlgmr.msra.gmra.mxu0 %vm28_vm1, %v18_v5  ;;  %364 = vmatprep.subr.mxu0 %v416_v1  ;;  %v203_v27 = vld [vmem:[%s550_s3 + $0x10] sm:$0xff]  ;;  %v202_v28 = vld [vmem:[%s550_s3 + $0x8] sm:$0xff]  ;;  %v201_v29 = vld [vmem:[%s550_s3] sm:$0xff] }
   0xa   :  { %380 = vmatprep.mubr.msk.f32.mxu0 %vm417_vm0, %v416_v1  ;;  %350 = vmatpush3.msra.mxu1 %v113_v8  ;;  %v306_v30 = vld [vmem:[%s549_s2 + $0x40] ss:$0 sm:$0xff]  ;;  %s394_s2 = scalar_lea.vmem %s296_s9, 128 }
   0xb   :  { %351 = vmatprep.subr.mxu1 %v416_v1  ;;  %365 = vmatpush3.msra.mxu0 %v208_v22  ;;  %v309_v38 = vld [vmem:[%s550_s3 + $0x40] ss:$0 sm:$0xff]  ;;  %p395_p0 = scmp.ne.s32.totalorder %s296_s9, %s394_s2  ;;  %p400_p2 = scmp.lt.s32.totalorder %s394_s2, %s394_s2 }
   0xc   :  { %352 = vmatpush3.msra.mxu1 %v112_v9  ;;  %366 = vmatprep.subr.mxu0 %v416_v1 }
   0xd   :  { %353 = vmatprep.subr.mxu1 %v416_v1  ;;  %367 = vmatpush3.msra.mxu0 %v207_v23  ;;  %p401_p3 = por %p400_p2, %p399_p1 }
   0xe   :  { %354 = vmatpush3.msra.mxu1 %v111_v10  ;;  %368 = vmatprep.subr.mxu0 %v416_v1 }
   0xf   :  { %355 = vmatprep.subr.mxu1 %v416_v1  ;;  %369 = vmatpush3.msra.mxu0 %v206_v24  ;;  %p402_p4 = pnand %p401_p3, %p395_p0 }
  0x10   :  { %356 = vmatpush3.msra.mxu1 %v110_v11  ;;  %370 = vmatprep.subr.mxu0 %v416_v1 }
  0x11   :  { %357 = vmatprep.subr.mxu1 %v416_v1  ;;  %371 = vmatpush3.msra.mxu0 %v205_v25 }
  0x12   :  { %358 = vmatpush3.msra.mxu1 %v109_v12  ;;  %372 = vmatprep.subr.mxu0 %v416_v1 }
  0x13   :  { %359 = vmatprep.subr.mxu1 %v416_v1  ;;  %373 = vmatpush3.msra.mxu0 %v204_v26 }
  0x14   :  { %360 = vmatpush3.msra.mxu1 %v108_v13  ;;  %374 = vmatprep.subr.mxu0 %v416_v1 }
  0x15   :  { %375 = vmatpush3.msra.mxu0 %v203_v27 }
  0x16   :  { %376 = vmatprep.subr.mxu0 %v416_v1 }
  0x17   :  { %377 = vmatpush3.msra.mxu0 %v202_v28 }
  0x18   :  { %378 = vmatprep.subr.mxu0 %v416_v1 }
  0x19   :  { %379 = vmatpush3.msra.mxu0 %v201_v29 }
  0xc9   :  { %v98_v15 = vpop.f32.mrf.mxu0 }
  0xca   :  { %v99_v16 = vadd.f32 %v303_v14, %v98_v15 }
  0xcb   :  { %v344_v17 = vpop.f32.mrf.mxu0 }
  0xcc   :  { %v305_v18 = vmul.f32 -1.442695, %v99_v16 }
  0xce   :  { %386 = vpow2.f32 %v305_v18 }
  0xdb   :  { %v387_v19 = vpop.eup %386 }
  0xdc   :  { %v105_v20 = vadd.f32 1.0, %v387_v19 }
  0xde   :  { %388 = vrcp.f32 %v105_v20 }
  0xeb   :  { %v389_v21 = vpop.eup %388 }
  0xec   :  { %362 = vmatmul.mubr.msk.f32.vlgmr.msra.gmra.mxu1 %vm121_vm2, %v389_v21 }
 0x1ac   :  { %v191_v31 = vpop.f32.mrf.mxu1 }
 0x1ad   :  { %v192_v32 = vadd.f32 %v306_v30, %v191_v31 }
 0x1ae   :  { %v363_v33 = vpop.f32.mrf.mxu1 }
 0x1af   :  { %v308_v34 = vmul.f32 -1.442695, %v192_v32 }
 0x1b1   :  { %390 = vpow2.f32 %v308_v34 }
 0x1be   :  { %v391_v35 = vpop.eup %390 }
 0x1bf   :  { %v198_v36 = vadd.f32 1.0, %v391_v35 }
 0x1c1   :  { %392 = vrcp.f32 %v198_v36 }
 0x1ce   :  { %v393_v37 = vpop.eup %392 }
 0x1cf   :  { %381 = vmatmul.mubr.msk.f32.vlgmr.msra.gmra.mxu0 %vm121_vm2, %v393_v37 }
 0x28f   :  { %v283_v39 = vpop.f32.mrf.mxu0 }
 0x290   :  { %v284_v40 = vadd.f32 %v309_v38, %v283_v39 }
 0x291   :  { %v382_v41 = vpop.f32.mrf.mxu0 }
 0x292   :  { %288 = vst.msk [vmem:[#allocation2] sm:$0xff] %vm287_vm3, %v284_v40 }
 0x293   :  { %405 = shalt.err (!%p402_p4)
}
 0x294   :  { %298 = dma.vmem_to_hbm [thread:$0]  %s296_s9, 128, %s551_s4, [#allocation3]  }
 0x295   :  { %414 = dma.done.wait [#allocation3], 128  }
 0x296   :  { %415 = vsyncadd [#allocation3], 4294967168 }
 0x297   :  { %302 = vsyncpa [#allocation3], 1 }

</bundles_post_ra>
